<compile_context>
chip_gen: v6e
topology: v6e:2x2x1
jax: 0.10.0
libtpu: 0.0.40
codegen_flags: <defaults>
</compile_context>

<pallas_src>
import functools

import jax
import jax.numpy as jnp
from jax import lax
from jax.experimental import pallas as pl
from jax.experimental.pallas import tpu as pltpu


def _round_up(x, m):
    return ((x + m - 1) // m) * m


def pam_flash_kernel(q_ref, k_ref, v_ref, x_ref, gamma_ref, o_ref,
                     m_sc, acc_sc, *, bf16_exp):
    """One (batch, query-tile, key-tile) step of position attention.

    Block shapes:
      q_ref : (1, CqA, TQ)  bf16  query tile (CqA = Cq, +1 bias row if padded)
      k_ref : (1, CqA, TK)  bf16  key tile   (bias row: 0 valid / -1e30 padded)
      v_ref : (1, C+1, TK)  bf16  value tile (last row all-ones -> softmax denom)
      x_ref : (1, C,   TQ)  f32   input tile (residual)
      o_ref : (1, C,   TQ)  f32   output tile
      m_sc  : (1, TQ)       f32   online-softmax running max
      acc_sc: (C+1, TQ)     f32   rows 0..C-1: unnormalized out; row C: running l
    """
    kj = pl.program_id(2)

    @pl.when(kj == 0)
    def _init():
        m_sc[...] = jnp.full_like(m_sc, -jnp.inf)
        acc_sc[...] = jnp.zeros_like(acc_sc)

    q = q_ref[0]                      # (CqA, TQ)
    k = k_ref[0]                      # (CqA, TK)
    v = v_ref[0]                      # (C+1, TK)

    # energy^T tile: s[j, i] = sum_c k[c, j] * q[c, i]     -> (TK, TQ), f32 acc.
    # Key padding is handled by the bias channel folded into q/k, so there is
    # no in-kernel mask pass.
    s = lax.dot_general(k, q, (((0,), (0,)), ((), ())),
                        preferred_element_type=jnp.float32)

    # Online softmax over the key axis (axis 0), per query column.
    m_prev = m_sc[...]                                                # (1, TQ)
    m_new = jnp.maximum(m_prev, jnp.max(s, axis=0, keepdims=True))    # (1, TQ)
    alpha = jnp.exp(m_prev - m_new)
    if bf16_exp:
        # bf16 EUP (v6e/v7x): faster exp, and p lands directly in the MXU dtype.
        p = jnp.exp((s - m_new).astype(jnp.bfloat16))                 # (TK, TQ)
    else:
        # v5e and older: no bf16 EUP/VPU -> f32 exp, then cast for the MXU.
        p = jnp.exp(s - m_new).astype(jnp.bfloat16)

    # pv rows 0..C-1: unnormalized output; row C: sum_j p[j, i] (V's ones row),
    # i.e. the softmax denominator. One matmul + one shared alpha-rescale pass.
    pv = lax.dot_general(v, p, (((1,), (0,)), ((), ())),
                         preferred_element_type=jnp.float32)          # (C+1, TQ)
    acc_sc[...] = alpha * acc_sc[...] + pv
    m_sc[...] = m_new

    @pl.when(kj == pl.num_programs(2) - 1)
    def _finalize():
        c = o_ref.shape[1]
        # Deferred normalization: one approx reciprocal per query (EUP slot).
        inv_l = pl.reciprocal(acc_sc[c:c + 1, :], approx=True)        # (1, TQ)
        o_ref[0] = (gamma_ref[0, 0] * (acc_sc[:c, :] * inv_l)
                    + x_ref[0]).astype(o_ref.dtype)


def pam_module(x, wq, bq, wk, bk, wv, bv, gamma):
    """Position attention module forward. x: (B, C, H, W) f32 -> (B, C, H, W)."""
    B, C, H, W = x.shape
    HW = H * W
    Cq = wq.shape[0]

    # --- cheap O(HW) projections in XLA; the O(HW^2) attention is the kernel ---
    # Fused query/key 1x1 projection: one stacked channel matmul (kernel_size=1
    # makes the PyTorch dilation=2 a no-op here).
    x_flat = x.reshape(B, C, HW)
    wqk = jnp.concatenate([wq, wk], axis=0)                  # (2Cq, C)
    bqk = jnp.concatenate([bq, bk], axis=0)                  # (2Cq,)
    qk = jnp.einsum('oc,bcs->bos', wqk, x_flat) + bqk[None, :, None]
    q, k = qk[:, :Cq], qk[:, Cq:]                            # (B, Cq, HW)

    # TODO(synk): the 3x3 dilated value conv stays in XLA (avoids a 9x taps
    # tensor in HBM); it could be fused in-kernel with a per-key-tile halo slab.
    v = lax.conv_general_dilated(
        x, wv, window_strides=(1, 1), padding=((2, 2), (2, 2)),
        rhs_dilation=(2, 2), dimension_numbers=('NCHW', 'OIHW', 'NCHW'),
    ) + bv[None, :, None, None]
    v = v.reshape(B, C, HW)

    # --- decoupled lane-dense tiles: big TQ cuts K/V re-streaming, big TK cuts
    # per-step online-softmax bookkeeping; single tile for small HW ---
    LANE = 128
    if HW <= 1024:
        TQ = TK = max(LANE, _round_up(HW, LANE))
    else:
        TQ, TK = 1024, 512            # HWp below is a multiple of both
    HWp = _round_up(HW, TQ)
    pad = HWp - HW

    padw = ((0, 0), (0, 0), (0, pad))
    qp = jnp.pad(q, padw)
    kp = jnp.pad(k, padw)
    vp = jnp.pad(v, padw)
    xp = jnp.pad(x_flat, padw).astype(jnp.float32)

    if pad:
        # Fold the key-padding mask into the energy matmul: extra channel with
        # q row of ones and k row of (0 valid / -1e30 padded). Zero VPU cost.
        ones_row = jnp.ones((B, 1, HWp), qp.dtype)
        kbias = jnp.where(jnp.arange(HWp) < HW, 0.0, -1e30).astype(kp.dtype)
        qp = jnp.concatenate([qp, ones_row], axis=1)
        kp = jnp.concatenate(
            [kp, jnp.broadcast_to(kbias[None, None, :], (B, 1, HWp))], axis=1)
    # Append an all-ones row to V so the softmax denominator l is produced by
    # the same PV matmul and alpha-rescale (no separate l scratch / row-sum).
    vp = jnp.concatenate([vp, jnp.ones((B, 1, HWp), vp.dtype)], axis=1)

    # bf16 streams for Q/K/V halve DMA traffic and make the MXU matmuls native
    # bf16 (f32 accumulation is kept via preferred_element_type).
    qp = qp.astype(jnp.bfloat16)
    kp = kp.astype(jnp.bfloat16)
    vp = vp.astype(jnp.bfloat16)
    gamma_smem = jnp.reshape(gamma, (1, 1)).astype(jnp.float32)

    CqA = qp.shape[1]                 # Cq (+1 when padded)
    Cv = vp.shape[1]                  # C + 1
    nq = HWp // TQ
    nk = HWp // TK

    # bf16 exp only where the EUP supports it (v6e / v7x); f32 exp elsewhere.
    kind = jax.devices()[0].device_kind.lower()
    bf16_exp = not any(t in kind for t in ("v2", "v3", "v4", "v5"))

    # TODO(synk): on DMA-bound v5e, a fully VMEM-resident K/V variant (full
    # padded key extent per batch, in-kernel key loop, no nk grid axis) would
    # remove the nq-fold K/V re-streaming entirely.
    kernel = functools.partial(pam_flash_kernel, bf16_exp=bf16_exp)

    out_p = pl.pallas_call(
        kernel,
        out_shape=jax.ShapeDtypeStruct((B, C, HWp), jnp.float32),
        grid_spec=pltpu.PrefetchScalarGridSpec(
            num_scalar_prefetch=0,
            grid=(B, nq, nk),
            in_specs=[
                pl.BlockSpec((1, CqA, TQ), lambda b, i, j: (b, 0, i)),   # Q
                pl.BlockSpec((1, CqA, TK), lambda b, i, j: (b, 0, j)),   # K
                pl.BlockSpec((1, Cv, TK), lambda b, i, j: (b, 0, j)),    # V (+ones)
                pl.BlockSpec((1, C, TQ), lambda b, i, j: (b, 0, i)),     # x residual
                pl.BlockSpec(memory_space=pltpu.MemorySpace.SMEM),       # gamma
            ],
            out_specs=pl.BlockSpec((1, C, TQ), lambda b, i, j: (b, 0, i)),
            scratch_shapes=[
                pltpu.VMEM((1, TQ), jnp.float32),    # running max m
                pltpu.VMEM((Cv, TQ), jnp.float32),   # unnormalized acc + l row
            ],
        ),
        compiler_params=pltpu.CompilerParams(
            # batch & query tiles shard across TensorCores; the key axis carries
            # the online-softmax state so it stays sequential (and last).
            dimension_semantics=("parallel", "parallel", "arbitrary"),
            # ~12-15 MiB of double-buffered tiles + scratch even at C=512,
            # TQ=1024, TK=512; 48 MiB clears v5e's scoped default and stays
            # under v7x's 64 MiB per-TC VMEM.
            vmem_limit_bytes=48 * 1024 * 1024,
        ),
    )(qp, kp, vp, xp, gamma_smem)

    return out_p[:, :, :HW].reshape(B, C, H, W)


def pam_reference(x, wq, bq, wk, bk, wv, bv, gamma):
    """Pure-JAX reference mirroring the PyTorch forward."""
    B, C, H, W = x.shape
    HW = H * W
    q = jnp.einsum('oc,bchw->bohw', wq, x) + bq[None, :, None, None]
    k = jnp.einsum('oc,bchw->bohw', wk, x) + bk[None, :, None, None]
    v = lax.conv_general_dilated(
        x, wv, window_strides=(1, 1), padding=((2, 2), (2, 2)),
        rhs_dilation=(2, 2), dimension_numbers=('NCHW', 'OIHW', 'NCHW'),
    ) + bv[None, :, None, None]
    qf = q.reshape(B, -1, HW)
    kf = k.reshape(B, -1, HW)
    vf = v.reshape(B, C, HW)
    energy = jnp.einsum('bci,bcj->bij', qf, kf)
    att = jax.nn.softmax(energy, axis=-1)
    out = jnp.einsum('bcj,bij->bci', vf, att).reshape(B, C, H, W)
    return gamma * out + x


if __name__ == "__main__":
    B, C, H, W = 2, 16, 8, 8          # in_dim=16 -> query/key channels = 16//8 = 2
    Cq = C // 8

    key = jax.random.PRNGKey(0)
    k_x, k_wq, k_bq, k_wk, k_bk, k_wv, k_bv = jax.random.split(key, 7)

    x = jax.random.normal(k_x, (B, C, H, W), dtype=jnp.float32)

    # Conv2d-shaped parameters from __init__. Note: PyTorch initializes gamma to
    # 0; we use 0.5 so the attention path is actually exercised.
    wq = 0.1 * jax.random.normal(k_wq, (Cq, C), dtype=jnp.float32)        # 1x1 conv
    bq = 0.1 * jax.random.normal(k_bq, (Cq,), dtype=jnp.float32)
    wk = 0.1 * jax.random.normal(k_wk, (Cq, C), dtype=jnp.float32)
    bk = 0.1 * jax.random.normal(k_bk, (Cq,), dtype=jnp.float32)
    wv = 0.1 * jax.random.normal(k_wv, (C, C, 3, 3), dtype=jnp.float32)   # 3x3 dilated conv
    bv = 0.1 * jax.random.normal(k_bv, (C,), dtype=jnp.float32)
    gamma = jnp.float32(0.5)

    out = jax.block_until_ready(pam_module(x, wq, bq, wk, bk, wv, bv, gamma))
    ref = pam_reference(x, wq, bq, wk, bk, wv, bv, gamma)

    assert out.shape == (B, C, H, W)
    err = jnp.max(jnp.abs(out - ref))
    assert jnp.allclose(out, ref, rtol=1e-2, atol=2e-2), f"max abs err {err}"

    print("KERNEL_OK")
</pallas_src>

<mosaic_0001>
module attributes {stable_mosaic.version = 11 : i64} {
  func.func @pam_flash_kernel(%arg0: i32, %arg1: i32, %arg2: i32, %arg3: memref<1x3x128xbf16, #tpu.memory_space<vmem>>, %arg4: memref<1x3x128xbf16, #tpu.memory_space<vmem>>, %arg5: memref<1x17x128xbf16, #tpu.memory_space<vmem>>, %arg6: memref<1x16x128xf32, #tpu.memory_space<vmem>>, %arg7: memref<1x1xf32, #tpu.memory_space<smem>>, %arg8: memref<1x16x128xf32, #tpu.memory_space<vmem>>, %arg9: memref<1x128xf32, #tpu.memory_space<vmem>>, %arg10: memref<17x128xf32, #tpu.memory_space<vmem>>) attributes {dimension_semantics = [#tpu.dimension_semantics<parallel>, #tpu.dimension_semantics<parallel>, #tpu.dimension_semantics<arbitrary>], iteration_bounds = array<i64: 2, 1, 1>, scalar_prefetch = 0 : i64, scratch_operands = 2 : i64, tpu.core_type = #tpu.core_type<tc>, window_params = [{transform_indices = @transform_0, window_bounds = array<i64: 1, 3, 128>}, {transform_indices = @transform_1, window_bounds = array<i64: 1, 3, 128>}, {transform_indices = @transform_2, window_bounds = array<i64: 1, 17, 128>}, {transform_indices = @transform_3, window_bounds = array<i64: 1, 16, 128>}, {transform_indices = @transform_4, window_bounds = array<i64: 1, 1>}, {transform_indices = @transform_5, window_bounds = array<i64: 1, 16, 128>}]} {
    %c0_i32 = arith.constant 0 : i32
    %0 = arith.cmpi eq, %arg2, %c0_i32 : i32
    %1 = arith.extui %0 : i1 to i32
    %c0_i32_0 = arith.constant 0 : i32
    %2 = arith.cmpi ne, %1, %c0_i32_0 : i32
    scf.if %2 {
      %cst_21 = arith.constant 0xFF800000 : f32
      %30 = vector.broadcast %cst_21 : f32 to vector<1x128xf32>
      %c0_22 = arith.constant 0 : index
      %c0_23 = arith.constant 0 : index
      %31 = vector.load %arg9[%c0_22, %c0_23] : memref<1x128xf32, #tpu.memory_space<vmem>>, vector<1x128xf32>
      tpu.vector_store %arg9[%c0_22, %c0_23], %30 {strides = array<i32>} : memref<1x128xf32, #tpu.memory_space<vmem>>, vector<1x128xf32>,
      %cst_24 = arith.constant 0.000000e+00 : f32
      %32 = vector.broadcast %cst_24 : f32 to vector<17x128xf32>
      %c0_25 = arith.constant 0 : index
      %c0_26 = arith.constant 0 : index
      %33 = vector.load %arg10[%c0_25, %c0_26] : memref<17x128xf32, #tpu.memory_space<vmem>>, vector<17x128xf32>
      tpu.vector_store %arg10[%c0_25, %c0_26], %32 {strides = array<i32>} : memref<17x128xf32, #tpu.memory_space<vmem>>, vector<17x128xf32>,
    } else {
    }
    %c0 = arith.constant 0 : index
    %c0_1 = arith.constant 0 : index
    %c0_2 = arith.constant 0 : index
    %3 = vector.load %arg3[%c0, %c0_1, %c0_2] : memref<1x3x128xbf16, #tpu.memory_space<vmem>>, vector<1x3x128xbf16>
    %4 = vector.shape_cast %3 : vector<1x3x128xbf16> to vector<3x128xbf16>
    %c0_3 = arith.constant 0 : index
    %c0_4 = arith.constant 0 : index
    %c0_5 = arith.constant 0 : index
    %5 = vector.load %arg4[%c0_3, %c0_4, %c0_5] : memref<1x3x128xbf16, #tpu.memory_space<vmem>>, vector<1x3x128xbf16>
    %6 = vector.shape_cast %5 : vector<1x3x128xbf16> to vector<3x128xbf16>
    %c0_6 = arith.constant 0 : index
    %c0_7 = arith.constant 0 : index
    %c0_8 = arith.constant 0 : index
    %7 = vector.load %arg5[%c0_6, %c0_7, %c0_8] : memref<1x17x128xbf16, #tpu.memory_space<vmem>>, vector<1x17x128xbf16>
    %8 = vector.shape_cast %7 : vector<1x17x128xbf16> to vector<17x128xbf16>
    %cst = arith.constant dense<0.000000e+00> : vector<128x128xf32>
    %9 = tpu.matmul %6, %4, %cst {dimension_numbers = #tpu.dot_dimension_numbers<[0], [0], [1], [1], [0, 1, 1, 1], [], []>} : vector<3x128xbf16>, vector<3x128xbf16>, vector<128x128xf32> -> vector<128x128xf32>
    %c0_9 = arith.constant 0 : index
    %c0_10 = arith.constant 0 : index
    %10 = vector.load %arg9[%c0_9, %c0_10] : memref<1x128xf32, #tpu.memory_space<vmem>>, vector<1x128xf32>
    %cst_11 = arith.constant dense<0xFF800000> : vector<128xf32>
    %11 = vector.multi_reduction <maximumf>, %9, %cst_11 [0] : vector<128x128xf32> to vector<128xf32>
    %12 = vector.shape_cast %11 : vector<128xf32> to vector<1x128xf32>
    %13 = arith.maximumf %10, %12 : vector<1x128xf32>
    %14 = arith.subf %10, %13 : vector<1x128xf32>
    %15 = math.exp %14 : vector<1x128xf32>
    %16 = vector.broadcast %13 : vector<1x128xf32> to vector<128x128xf32>
    %17 = arith.subf %9, %16 : vector<128x128xf32>
    %18 = arith.truncf %17 : vector<128x128xf32> to vector<128x128xbf16>
    %19 = math.exp %18 : vector<128x128xbf16>
    %cst_12 = arith.constant dense<0.000000e+00> : vector<17x128xf32>
    %20 = tpu.matmul %8, %19, %cst_12 {dimension_numbers = #tpu.dot_dimension_numbers<[1], [0], [0], [1], [0, 0, 1, 1], [], []>} : vector<17x128xbf16>, vector<128x128xbf16>, vector<17x128xf32> -> vector<17x128xf32>
    %c0_13 = arith.constant 0 : index
    %c0_14 = arith.constant 0 : index
    %21 = vector.load %arg10[%c0_13, %c0_14] : memref<17x128xf32, #tpu.memory_space<vmem>>, vector<17x128xf32>
    %22 = vector.broadcast %15 : vector<1x128xf32> to vector<17x128xf32>
    %23 = arith.mulf %22, %21 : vector<17x128xf32>
    %24 = arith.addf %23, %20 : vector<17x128xf32>
    %c0_15 = arith.constant 0 : index
    %c0_16 = arith.constant 0 : index
    %25 = vector.load %arg10[%c0_15, %c0_16] : memref<17x128xf32, #tpu.memory_space<vmem>>, vector<17x128xf32>
    tpu.vector_store %arg10[%c0_15, %c0_16], %24 {strides = array<i32>} : memref<17x128xf32, #tpu.memory_space<vmem>>, vector<17x128xf32>,
    %c0_17 = arith.constant 0 : index
    %c0_18 = arith.constant 0 : index
    %26 = vector.load %arg9[%c0_17, %c0_18] : memref<1x128xf32, #tpu.memory_space<vmem>>, vector<1x128xf32>
    tpu.vector_store %arg9[%c0_17, %c0_18], %13 {strides = array<i32>} : memref<1x128xf32, #tpu.memory_space<vmem>>, vector<1x128xf32>,
    %c0_i32_19 = arith.constant 0 : i32
    %27 = arith.cmpi eq, %arg2, %c0_i32_19 : i32
    %28 = arith.extui %27 : i1 to i32
    %c0_i32_20 = arith.constant 0 : i32
    %29 = arith.cmpi ne, %28, %c0_i32_20 : i32
    scf.if %29 {
      %c16 = arith.constant 16 : index
      %c0_21 = arith.constant 0 : index
      %30 = vector.load %arg10[%c16, %c0_21] : memref<17x128xf32, #tpu.memory_space<vmem>>, vector<1x128xf32>
      %31 = tpu.reciprocal %30 {approx = true} : vector<1x128xf32> -> vector<1x128xf32>
      %c0_22 = arith.constant 0 : index
      %c0_23 = arith.constant 0 : index
      %32 = memref.load %arg7[%c0_22, %c0_23] : memref<1x1xf32, #tpu.memory_space<smem>>
      %c0_24 = arith.constant 0 : index
      %c0_25 = arith.constant 0 : index
      %33 = vector.load %arg10[%c0_24, %c0_25] : memref<17x128xf32, #tpu.memory_space<vmem>>, vector<16x128xf32>
      %34 = vector.broadcast %31 : vector<1x128xf32> to vector<16x128xf32>
      %35 = arith.mulf %33, %34 : vector<16x128xf32>
      %36 = vector.broadcast %32 : f32 to vector<16x128xf32>
      %37 = arith.mulf %36, %35 : vector<16x128xf32>
      %c0_26 = arith.constant 0 : index
      %c0_27 = arith.constant 0 : index
      %c0_28 = arith.constant 0 : index
      %38 = vector.load %arg6[%c0_26, %c0_27, %c0_28] : memref<1x16x128xf32, #tpu.memory_space<vmem>>, vector<1x16x128xf32>
      %39 = vector.shape_cast %38 : vector<1x16x128xf32> to vector<16x128xf32>
      %40 = arith.addf %37, %39 : vector<16x128xf32>
      %c0_29 = arith.constant 0 : index
      %c0_30 = arith.constant 0 : index
      %c0_31 = arith.constant 0 : index
      %41 = vector.load %arg8[%c0_29, %c0_30, %c0_31] : memref<1x16x128xf32, #tpu.memory_space<vmem>>, vector<1x16x128xf32>
      %42 = vector.shape_cast %41 : vector<1x16x128xf32> to vector<16x128xf32>
      %43 = vector.shape_cast %40 : vector<16x128xf32> to vector<1x16x128xf32>
      tpu.vector_store %arg8[%c0_29, %c0_30, %c0_31], %43 {strides = array<i32>} : memref<1x16x128xf32, #tpu.memory_space<vmem>>, vector<1x16x128xf32>,
    } else {
    }
    return
  }
  func.func @transform_0(%arg0: i32, %arg1: i32, %arg2: i32) -> (i32, i32, i32) {
    %c0_i32 = arith.constant 0 : i32
    %c0_i32_0 = arith.constant 0 : i32
    return %arg0, %c0_i32, %arg1 : i32, i32, i32
  }
  func.func @transform_1(%arg0: i32, %arg1: i32, %arg2: i32) -> (i32, i32, i32) {
    %c0_i32 = arith.constant 0 : i32
    %c0_i32_0 = arith.constant 0 : i32
    return %arg0, %c0_i32, %arg2 : i32, i32, i32
  }
  func.func @transform_2(%arg0: i32, %arg1: i32, %arg2: i32) -> (i32, i32, i32) {
    %c0_i32 = arith.constant 0 : i32
    %c0_i32_0 = arith.constant 0 : i32
    return %arg0, %c0_i32, %arg2 : i32, i32, i32
  }
  func.func @transform_3(%arg0: i32, %arg1: i32, %arg2: i32) -> (i32, i32, i32) {
    %c0_i32 = arith.constant 0 : i32
    %c0_i32_0 = arith.constant 0 : i32
    return %arg0, %c0_i32, %arg1 : i32, i32, i32
  }
  func.func @transform_4(%arg0: i32, %arg1: i32, %arg2: i32) -> (i32, i32) {
    %c0_i32 = arith.constant 0 : i32
    %c0_i32_0 = arith.constant 0 : i32
    %c0_i32_1 = arith.constant 0 : i32
    return %c0_i32, %c0_i32_0 : i32, i32
  }
  func.func @transform_5(%arg0: i32, %arg1: i32, %arg2: i32) -> (i32, i32, i32) {
    %c0_i32 = arith.constant 0 : i32
    %c0_i32_0 = arith.constant 0 : i32
    return %arg0, %c0_i32, %arg1 : i32, i32, i32
  }
}

</mosaic_0001>

<bundles_post_ra>
// kernel: tpu_custom_call.1
= control target key start
LH: loop header
LB: loop body
LE: loop exit
PB: predicated region body
PF: predicated region fallthrough
CT: control target
= control target key end

     0   :  { %s1297_s0 = inlined_call_operand.vmem [shape: bf16[2,3,128], index: 0, kind: input, shape index: {}]   ;;  %s1298_s1 = inlined_call_operand.vmem [shape: bf16[2,3,128], index: 1, kind: input, shape index: {}]   ;;  %s1299_s2 = inlined_call_operand.vmem [shape: bf16[2,17,128], index: 2, kind: input, shape index: {}]   ;;  %s1300_s3 = inlined_call_operand.vmem [shape: f32[2,16,128], index: 3, kind: input, shape index: {}]   ;;  %s1301_s4 = inlined_call_operand.<no memory space> [shape: f32[1,1], index: 4, kind: input, shape index: {}]   ;;  %s1302_s5 = inlined_call_operand.hbm [shape: f32[2,16,128], index: 5, kind: output, shape index: {}]  }
   0x1   :  { %10 = sst [smem:[#allocation4]] %s1301_s4 }
   0x2   :  { %11 = vsyncpa [#allocation6], 0 }
   0x3   :  { %13 = vsyncpa [#allocation6 + $0x1], 0  ;;  %s1112_s20 = smov 0   ;;  %s1114_s21 = smov 0  }
   0x4   :  { %s1116_s22 = smov 0   ;;  %s1118_s23 = smov 0  }
   0x5   :  { %s1120_s24 = smov 0   ;;  %s1122_s25 = smov 0  }
   0x6 LB: > { %s826_s4 = sadd.s32 4294967295, %s1071_s25   ;;  %s827_s26 = sadd.s32 4294967294, %s1071_s25   ;;  %s1071_s25 = sphi %s1122_s25, %s19_s25   ;;  %s1067_s24 = sphi %s1120_s24, %s1309_s24   ;;  %s1063_s23 = sphi %s1118_s23, %s1308_s23   ;;  %s1059_s22 = sphi %s1116_s22, %s1307_s22   ;;  %s1055_s21 = sphi %s1114_s21, %s1306_s21   ;;  %s1051_s20 = sphi %s1112_s20, %s1305_s20  }
   0x7   : > { %s38_s27 = sadd.s32 1, %s1067_s24  ;;  %s180_s28 = sadd.s32 1, %s1059_s22 }
   0x8   : > { %p40_p0 = scmp.ge.s32.totalorder %s38_s27, 2  ;;  %p190_p1 = scmp.ne.s32.totalorder %s1059_s22, %s1055_s21 }
   0x9   : > { %p191_p2 = scmp.eq.s32.totalorder %s826_s4, 1  ;;  %p196_p3 = scmp.ne.s32.totalorder %s1055_s21, %s1051_s20 }
   0xa   : > { %s1311_s27 = smov (%p40_p0, %s38_s27), 0  ;;  %p197_p5 = scmp.eq.s32.totalorder %s827_s26, 1 }
   0xb   : > { %p1152_p4 = por %p191_p2, %p190_p1  ;;  %s175_s30 = ssub.s32 %s1067_s24, %s1311_s27 }
   0xc   : > { %p830_p6 = scmp.ge.s32.totalorder %s1071_s25, 1  ;;  %p178_p7 = scmp.eq.s32.totalorder %s175_s30, 0 }
   0xd   : > { %p1159_p8 = por %p197_p5, %p196_p3  ;;  %p260_p9 = scmp.lt.s32.totalorder %s1071_s25, 3 }
   0xe   : > { %s1165_s7 = scalar_select %p178_p7, %s1059_s22, %s180_s28  }
   0xf   : > { %p261_p10 = pnand %p830_p6, %p260_p9 }
  0x10   : > { %p313_p11 = scmp.lt.s32.totalorder (!%p261_p10), %s1063_s23, 1  ;;  %s310_s4 = sand.u32 (!%p261_p10), 1, %s1055_s21  }
  0x11   : > { %264 = sbr.rel (%p261_p10) target bundleno = 667 (0x29b), region = 40  ;;  %s664_s26 = sld [smem:[#allocation4]] (!%p261_p10) }
  0x12   : > { %s831_s28 = sshll.u32 (!%p261_p10), %s310_s4, 4  ;;  %s1076_s18 = smov (!%p261_p10), [#allocation5]  }
  0x13   : > { %s312_s13 = scalar_lea.vmem (!%p261_p10), [#allocation5], %s831_s28 }
  0x14   : > { %s697_s14 = sshll.u32 (!%p261_p10), %s312_s13, 4  ;;  %s1250_s14 = int_to_ptr.vmem [resolvable:$true] %s697_s14 }
  0x15   : > { %s995_s17 = scalar_lea.vmem (!%p261_p10), %s1250_s14, 256 }
  0x16   : > { %vm398_vm0 = vcmask 1040384   ;;  %s1169_s8 = scalar_select %p313_p11, %s1063_s23, 1  ;;  %vm399_vm1 = vcmask 1041408   ;;  %v1073_v0 = vmov 65535   ;;  %vm373_vm2 = vcmask 23552  }
  0x17   : > { %v400_v1 = vsel %vm398_vm0, 4294967295, %v1073_v0  ;;  %v1074_v14 = vmov -inf   ;;  %v1075_v15 = vmov 0.0   ;;  %v529_v50 = vlaneseq  ;;  %p996_p12 = scmp.ne.s32.totalorder %s1250_s14, %s995_s17 }
  0x18   : > { %s832_s9 = sshll.u32 %s1169_s8, 1  ;;  %v401_v2 = vsel %vm399_vm1, %v400_v1, 0  ;;  %348 = vst [vmem:[#allocation2] sm:$0x1] %v1074_v14  ;;  %351 = vst [vmem:[#allocation3 + $0x8] sm:$0x1] %v1075_v15 }
  0x19   : > { %s326_s12 = scalar_lea.vmem %s1298_s1, %s832_s9  ;;  %s319_s15 = scalar_lea.vmem %s1297_s0, %s832_s9  ;;  %v530_v53 = vshrl.u32 %v529_v50, 7 }
  0x1a   : > { %v353_v3 = vld [vmem:[%s326_s12] sm:$0x3]  ;;  %s911_s16 = smul.u32 12, %s1169_s8  ;;  %s852_s30 = sshll.u32 %s1169_s8, 4 }
  0x1b   : > { %357 = vxpose.xlu0.c.b16.start.end [1/1] (short) %v353_v3, 128  ;;  %v352_v4 = vld [vmem:[%s319_s15] sm:$0x3]  ;;  %v1216_v57 = vsub.s32 0, %v530_v53  ;;  %s342_s11 = scalar_lea.vmem %s1300_s3, %s852_s30  ;;  %s853_s12 = sshll.u32 %s1063_s23, 8 }
  0x1c   : > { %v403_v5 = vand.u32 %v401_v2, %v352_v4  ;;  %s1190_s19 = scalar_lea.vmem %s1299_s2, %s911_s16  ;;  %s1248_s16 = scalar_lea.hbm %s1302_s5, %s853_s12 }
  0x1d   : > { %v973_v16 = vld [vmem:[%s1190_s19] sm:$0xff]   ;;  %s1252_s23 = scalar_lea.sflag [#allocation6], %s310_s4  ;;  %p997_p13 = pnand %p996_p12, %p1152_p4 }
  0x1e   : > { %873 = vmatprep.subr.bf16.mxu0 %v403_v5  ;;  %907 = vmatprep.mubr.bf16.mxu1 %v973_v16 }
  0x1f   : > { %874 = vmatpush3.bf16.msra.mxu0 %v403_v5  ;;  %v1214_v55 = vld [vmem:[#allocation2] sm:$0x1]  ;;  %p998_p0 = pneg %p997_p13 }
  0x7d   : > { %v365_v6 = vpop.trf.xlu0 }
  0x7e   : > { %875 = vmatprep.mubr.msk.bf16.mxu0 %vm373_vm2, %v365_v6 }
  0x81   : > { %v366_v7 = vpop.trf.xlu0 }
  0x82   : > { %876 = vmatmul.mubr.msk.bf16.vlgmr.msra.gmra.mxu0 %vm373_vm2, %v366_v7 }
  0x85   : > { %v367_v8 = vpop.trf.xlu0 }
  0x86   : > { %879 = vmatprep.mubr.msk.bf16.mxu0 %vm373_vm2, %v367_v8 }
  0x89   : > { %v368_v9 = vpop.trf.xlu0 }
  0x8a   : > { %880 = vmatmul.mubr.msk.bf16.gmra.mxu0 %vm373_vm2, %v368_v9 }
  0x8d   : > { %v369_v10 = vpop.trf.xlu0 }
  0x8e   : > { %883 = vmatprep.mubr.msk.bf16.mxu0 %vm373_vm2, %v369_v10 }
  0x91   : > { %v370_v11 = vpop.trf.xlu0 }
  0x92   : > { %884 = vmatmul.mubr.msk.bf16.gmra.mxu0 %vm373_vm2, %v370_v11 }
  0x95   : > { %v371_v12 = vpop.trf.xlu0 }
  0x96   : > { %887 = vmatprep.mubr.msk.bf16.mxu0 %vm373_vm2, %v371_v12 }
  0x99   : > { %v372_v13 = vpop.trf.xlu0 }
  0x9a   : > { %888 = vmatmul.mubr.msk.bf16.gmra.mxu0 %vm373_vm2, %v372_v13 }
 0x142   : > { %v1193_v17 = vpop.f32.mrf.mxu0 }
 0x144   : > { %v1195_v18 = vpop.f32.mrf.mxu0 }
 0x146   : > { %v878_v19 = vpop.f32.mrf.mxu0 }
 0x148   : > { %v1197_v20 = vpop.f32.mrf.mxu0 }
 0x14a   : > { %v1199_v21 = vpop.f32.mrf.mxu0 }
 0x14b   : > { %v505_v32 = vmax.f32 %v1193_v17, %v1199_v21 }
 0x14c   : > { %v1201_v22 = vpop.f32.mrf.mxu0 }
 0x14d   : > { %v503_v33 = vmax.f32 %v1195_v18, %v1201_v22 }
 0x14e   : > { %v1203_v23 = vpop.f32.mrf.mxu0 }
 0x14f   : > { %v506_v30 = vmax.f32 %v878_v19, %v1203_v23 }
 0x150   : > { %v1205_v24 = vpop.f32.mrf.mxu0 }
 0x151   : > { %v504_v34 = vmax.f32 %v1197_v20, %v1205_v24 }
 0x152   : > { %v885_v25 = vpop.f32.mrf.mxu0 }
 0x153   : > { %v509_v37 = vmax.f32 %v505_v32, %v885_v25 }
 0x154   : > { %v471_v26 = vpop.f32.mrf.mxu0 }
 0x155   : > { %v507_v38 = vmax.f32 %v503_v33, %v471_v26 }
 0x156   : > { %v886_v27 = vpop.f32.mrf.mxu0 }
 0x157   : > { %v510_v35 = vmax.f32 %v506_v30, %v886_v27 }
 0x158   : > { %v474_v28 = vpop.f32.mrf.mxu0 }
 0x159   : > { %v508_v39 = vmax.f32 %v504_v34, %v474_v28 }
 0x15a   : > { %v889_v29 = vpop.f32.mrf.mxu0 }
 0x15b   : > { %v513_v42 = vmax.f32 %v509_v37, %v889_v29  ;;  %v974_v37 = vld [vmem:[%s1190_s19 + $0x8] ss:$0 sps:$4 sm:$0x11]   ;;  %s999_s19 = sshll.u32 %s1076_s18, 4  ;;  %s1000_s19 = int_to_ptr.vmem [resolvable:$false] %s999_s19 }
 0x15c   : > { %v487_v31 = vpop.f32.mrf.mxu0  ;;  %p1002_p1 = scmp.lt.s32.totalorder %s1250_s14, %s1000_s19 }
 0x15d   : > { %v511_v43 = vmax.f32 %v507_v38, %v487_v31 }
 0x15e   : > { %v890_v36 = vpop.f32.mrf.mxu0 }
 0x15f   : > { %v514_v40 = vmax.f32 %v510_v35, %v890_v36 }
 0x160   : > { %v490_v41 = vpop.f32.mrf.mxu0 }
 0x161   : > { %v512_v44 = vmax.f32 %v508_v39, %v490_v41  ;;  %v516_v45 = vmax.f32 %v513_v42, %v514_v40 }
 0x163   : > { %v515_v46 = vmax.f32 %v511_v43, %v512_v44 }
 0x165   : > { %v517_v47 = vmax.f32 %v515_v46, %v516_v45 }
 0x167   : > { %v518_v48 = vrot.slane %v517_v47, 4 }
 0x169   : > { %v519_v49 = vmax.f32 %v517_v47, %v518_v48 }
 0x16b   : > { %v520_v51 = vrot.slane %v519_v49, 2 }
 0x16d   : > { %v521_v52 = vmax.f32 %v519_v49, %v520_v51 }
 0x16f   : > { %v522_v54 = vrot.slane %v521_v52, 1 }
 0x171   : > { %v523_v56 = vmax.f32 %v521_v52, %v522_v54  ;;  %v673_v54 = vstv %s664_s26  ;;  %s1001_s26 = scalar_lea.vmem %s1000_s19, 512 }
 0x172   : > { %p1003_p2 = scmp.lt.s32.totalorder %s1001_s26, %s995_s17 }
 0x173   : > { %v1219_v58 = vmax.f32 %v1214_v55, %v523_v56 }
 0x174   : > { %p1004_p3 = por %p1003_p2, %p1002_p1 }
 0x175   : > { %v525_v59 = vsub.f32 %v1214_v55, %v1219_v58  ;;  %v532_v60 = vrot.slane %v1219_v58, %v1216_v57  ;;  %658 = vst [vmem:[#allocation2] sm:$0x1] %v1219_v58  ;;  %v676_v58 = vld [vmem:[%s342_s11] sm:$0xff] }
 0x176   : > { %p1005_p5 = pnand %p1004_p3, %p998_p0 }
 0x177   : > { %v546_v61 = vsub.f32 %v487_v31, %v532_v60  ;;  %v547_v62 = vsub.f32 %v490_v41, %v532_v60  ;;  %v548_v63 = vsub.f32 %v889_v29, %v532_v60  ;;  %v549_v0 = vsub.f32 %v890_v36, %v532_v60  ;;  %v642_v41 = vld [vmem:[#allocation3 + $0x8] sm:$0x1] }
 0x178   : > { %v544_v1 = vsub.f32 %v885_v25, %v532_v60  ;;  %v545_v2 = vsub.f32 %v886_v27, %v532_v60  ;;  %v542_v5 = vsub.f32 %v471_v26, %v532_v60  ;;  %v543_v6 = vsub.f32 %v474_v28, %v532_v60 }
 0x179   : > { %v556_v3 = vpack.c.bf16 %v547_v62, %v546_v61  ;;  %v557_v4 = vpack.c.bf16 %v549_v0, %v548_v63  ;;  %v536_v7 = vsub.f32 %v1193_v17, %v532_v60  ;;  %v537_v11 = vsub.f32 %v878_v19, %v532_v60 }
 0x17a   : > { %v555_v10 = vpack.c.bf16 %v545_v2, %v544_v1  ;;  %v534_v12 = vsub.f32 %v1195_v18, %v532_v60  ;;  %v535_v14 = vsub.f32 %v1197_v20, %v532_v60  ;;  %v540_v15 = vsub.f32 %v1199_v21, %v532_v60 }
 0x17b   : > { %v577_v8 = vmul.bf16 1069105081, %v556_v3  ;;  %v580_v9 = vmul.bf16 1069105081, %v557_v4  ;;  %v551_v13 = vpack.c.bf16 %v537_v11, %v536_v7  ;;  %v541_v16 = vsub.f32 %v1203_v23, %v532_v60 }
 0x17c   : > { %v574_v25 = vmul.bf16 1069105081, %v555_v10  ;;  %v554_v26 = vpack.c.bf16 %v543_v6, %v542_v5  ;;  %v550_v27 = vpack.c.bf16 %v535_v14, %v534_v12  ;;  %v538_v17 = vsub.f32 %v1201_v22, %v532_v60 }
 0x17d   : > { %975 = vpow.bf16 %v580_v9  ;;  %v553_v29 = vpack.c.bf16 %v541_v16, %v540_v15  ;;  %v539_v19 = vsub.f32 %v1205_v24, %v532_v60  ;;  %v562_v23 = vmul.bf16 1069105081, %v551_v13 }
 0x17e   : > { %977 = vpow.bf16 %v577_v8  ;;  %v571_v28 = vmul.bf16 1069105081, %v554_v26  ;;  %v559_v22 = vmul.bf16 1069105081, %v550_v27  ;;  %v526_v38 = vmul.f32 1.442695, %v525_v59 }
 0x17f   : > { %979 = vpow.bf16 %v574_v25  ;;  %v568_v18 = vmul.bf16 1069105081, %v553_v29  ;;  %v552_v30 = vpack.c.bf16 %v539_v19, %v538_v17  ;;  %v677_v59 = vld [vmem:[%s342_s11 + $0x8] sm:$0xff] }
 0x180   : > { %981 = vpow.bf16 %v571_v28 }
 0x181   : > { %983 = vpow.bf16 %v568_v18  ;;  %v565_v20 = vmul.bf16 1069105081, %v552_v30 }
 0x183   : > { %985 = vpow.bf16 %v565_v20 }
 0x184   : > { %987 = vpow.bf16 %v562_v23 }
 0x185   : > { %989 = vpow.bf16 %v559_v22 }
 0x186   : > { %991 = vpow2.f32 %v526_v38 }
 0x18b   : > { %v976_v31 = vpop.eup %975 }
 0x18c   : > { %891 = vmatprep.subr.bf16.mxu1 %v976_v31  ;;  %v978_v21 = vpop.eup %977 }
 0x18d   : > { %892 = vmatpush3.bf16.msra.mxu1 %v976_v31  ;;  %v980_v32 = vpop.eup %979 }
 0x18e   : > { %893 = vmatprep.subr.bf16.mxu1 %v978_v21  ;;  %v982_v33 = vpop.eup %981 }
 0x18f   : > { %v984_v24 = vpop.eup %983 }
 0x191   : > { %894 = vmatpush3.bf16.msra.mxu1 %v978_v21  ;;  %v986_v34 = vpop.eup %985 }
 0x192   : > { %895 = vmatprep.subr.bf16.mxu1 %v980_v32  ;;  %v988_v35 = vpop.eup %987 }
 0x193   : > { %v990_v36 = vpop.eup %989 }
 0x194   : > { %v992_v39 = vpop.eup %991 }
 0x195   : > { %896 = vmatpush3.bf16.msra.mxu1 %v980_v32  ;;  %v647_v40 = vrot.slane %v992_v39, %v1216_v57 }
 0x196   : > { %897 = vmatprep.subr.bf16.mxu1 %v982_v33 }
 0x197   : > { %v651_v42 = vmul.f32 %v647_v40, %v642_v41  ;;  %v649_v45 = vmul.f32 0.0, %v647_v40 }
 0x199   : > { %898 = vmatpush3.bf16.msra.mxu1 %v982_v33 }
 0x19a   : > { %899 = vmatprep.subr.bf16.mxu1 %v984_v24 }
 0x19d   : > { %900 = vmatpush3.bf16.msra.mxu1 %v984_v24 }
 0x19e   : > { %901 = vmatprep.subr.bf16.mxu1 %v986_v34 }
 0x1a1   : > { %902 = vmatpush3.bf16.msra.mxu1 %v986_v34 }
 0x1a2   : > { %903 = vmatprep.subr.bf16.mxu1 %v988_v35 }
 0x1a5   : > { %904 = vmatpush3.bf16.msra.mxu1 %v988_v35 }
 0x1a6   : > { %905 = vmatprep.subr.bf16.mxu1 %v990_v36 }
 0x1a9   : > { %906 = vmatpush3.bf16.msra.mxu1 %v990_v36 }
 0x1ac   : > { %908 = vmatmul.mubr.bf16.vlgmr.msra.gmra.mxu1 %v974_v37 }
 0x26c   : > { %v909_v43 = vpop.f32.mrf.mxu1 }
 0x26d   : > { %v654_v44 = vadd.f32 %v909_v43, %v651_v42 }
 0x26e   : > { %v626_v46 = vpop.f32.mrf.mxu1 }
 0x26f   : > { %657 = vst [vmem:[#allocation3 + $0x8] sm:$0x1] %v654_v44  ;;  %v652_v47 = vadd.f32 %v649_v45, %v626_v46 }
 0x270   : > { %v910_v48 = vpop.f32.mrf.mxu1 }
 0x272   : > { %v629_v49 = vpop.f32.mrf.mxu1 }
 0x273   : > { %v653_v50 = vadd.f32 %v649_v45, %v629_v49 }
 0x276   : > { %v662_v51 = vld [vmem:[#allocation3 + $0x8] sm:$0x1] }
 0x277   : > { %993 = vrcp.f32 %v662_v51 }
 0x284   : > { %v994_v52 = vpop.eup %993 }
 0x285   : > { %v670_v53 = vrot.slane %v994_v52, %v1216_v57 }
 0x287   : > { %v671_v55 = vmul.f32 %v670_v53, %v652_v47  ;;  %v672_v56 = vmul.f32 %v670_v53, %v653_v50 }
 0x289   : > { %v674_v60 = vmul.f32 %v673_v54, %v671_v55  ;;  %v675_v61 = vmul.f32 %v673_v54, %v672_v56 }
 0x28b   : > { %v678_v57 = vadd.f32 %v676_v58, %v674_v60  ;;  %v679_v62 = vadd.f32 %v677_v59, %v675_v61 }
 0x28d   : > { %680 = vst [vmem:[%s312_s13] sm:$0xff] %v678_v57  ;;  %681 = vst [vmem:[%s312_s13 + $0x8] sm:$0xff] %v679_v62 }
 0x28e   : > { %1008 = shalt.err (!%p1005_p5)
}
 0x28f   : > { %s1009_s4 = scalar_lea.hbm %s1248_s16, 256  ;;  %s1013_s9 = scalar_lea.hbm %s1302_s5, 512 }
 0x290   : > { %p1010_p6 = scmp.ne.s32.totalorder %s1248_s16, %s1009_s4  ;;  %p1014_p10 = scmp.lt.s32.totalorder %s1248_s16, %s1302_s5 }
 0x291   : > { %p1015_p11 = scmp.lt.s32.totalorder %s1013_s9, %s1009_s4 }
 0x292   : > { %p1011_p7 = pnand %p1010_p6, %p1152_p4 }
 0x293   : > { %p1016_p12 = por %p1015_p11, %p1014_p10 }
 0x294   : > { %p1012_p9 = pneg %p1011_p7 }
 0x296   : > { %p1017_p13 = pnand %p1016_p12, %p1012_p9 }
 0x298   : > { %1020 = shalt.err (!%p1017_p13)
}
 0x299   : > { %s1077_s12 = smov 128   ;;  %s1078_s13 = smov 8  }
 0x29a   : > { %912 = dma.vmem_to_hbm [thread:$0]  (%p1152_p4), %s1250_s14, 256, %s1248_s16, %s1252_s23, %s1077_s12, %s1077_s12, %s1078_s13  }
 0x29b PF: > { %p918_p0 = scmp.ge.s32.totalorder %s1071_s25, 2  ;;  %s712_s15 = sand.u32 1, %s1051_s20  }
 0x29c   : > { %s713_s8 = scalar_lea.sflag [#allocation6], %s712_s15 }
 0x29d   : > { %p915_p1 = pnand %p918_p0, %p1159_p8 }
 0x29f   : > { %p916_p2 = pneg %p915_p1 }
 0x2a1   : > { %1046 = dma.done.wait (%p916_p2), %s713_s8, 256  }
 0x2a2   : > { %1048 = vsyncadd (%p916_p2), %s713_s8, 4294967040  ;;  %s19_s25 = sadd.s32 1, %s1071_s25   ;;  %s1305_s20 = smov %s1055_s21 }
 0x2a3   : > { %p16_p3 = scmp.ge.s32.totalorder %s19_s25, 4   ;;  %s1306_s21 = smov %s1059_s22 }
 0x2a4   : > { %s1307_s22 = smov %s1165_s7  ;;  %s1308_s23 = smov %s1067_s24 }
 0x2a5   : > { %s1309_s24 = smov %s1311_s27  ;;  %18 = sbr.rel (!%p16_p3) target bundleno = 6 (0x6), region = 92 }
 0x2aa   :  { %718 = vsyncpa [#allocation6], 1 }
 0x2ab   :  { %720 = vsyncpa [#allocation6 + $0x1], 1 }

</bundles_post_ra>
